<compile_context>
chip_gen: v5e
topology: v5e:2x2
jax: 0.10.0
libtpu: 0.0.40
codegen_flags: <defaults>
</compile_context>

<pallas_src>
import math

import jax
import jax.numpy as jnp
from jax import lax
from jax.experimental import pallas as pl
from jax.experimental.pallas import tpu as pltpu


def _round_up(x, m):
    return (x + m - 1) // m * m


# ----------------------------------------------------------------------------
# Fused FFN kernel: one (tm, D) row-tile of x per grid step.
#   h = x @ Wa + ba ; h = gelu(h) ; y = h @ Wb + bb ; out = LN(y)*g + b + y
# ----------------------------------------------------------------------------
def _ffn_kernel(x_ref, wa_ref, ba_ref, wb_ref, bb_ref, g_ref, beta_ref, y_ref):
    x = x_ref[...]                                                  # (tm, D) bf16

    # linear_a (bf16 MXU operands, f32 accumulate) + bias
    h = jnp.dot(x, wa_ref[...],
                preferred_element_type=jnp.float32) + ba_ref[...]   # (tm, D) f32

    # GELU (tanh approximation), f32 elementwise; tanh runs on the EUP slot.
    c = 0.7978845608028654  # sqrt(2/pi)
    h2 = h * h
    inner = c * h * (1.0 + 0.044715 * h2)
    h = 0.5 * h * (1.0 + jnp.tanh(inner))

    # linear_b + bias
    y = jnp.dot(h.astype(jnp.bfloat16), wb_ref[...],
                preferred_element_type=jnp.float32) + bb_ref[...]   # (tm, OUT)

    # LayerNorm over the feature dim (torch defaults: biased var, eps=1e-5),
    # single-pass statistics: var = E[y^2] - mean^2 (clamped >= 0 for padded /
    # constant rows where rounding could make it slightly negative).
    mean = jnp.mean(y, axis=-1, keepdims=True)
    msq = jnp.mean(y * y, axis=-1, keepdims=True)
    var = jnp.maximum(msq - mean * mean, 0.0)
    normed = (y - mean) * lax.rsqrt(var + 1e-5)

    # norm(y)*gamma + beta + y  (residual on linear_b's output, as in reference)
    y_ref[...] = (normed * g_ref[...] + beta_ref[...] + y).astype(y_ref.dtype)


def ffn_apply(x, wa, ba, wb, bb, gamma, beta, *, tm=256, out_dtype=jnp.bfloat16):
    """Runs the fused FFN compute path. x: (B, S, D) f32 -> (B, S, OUT) out_dtype."""
    B, S, D = x.shape
    OUT = wb.shape[1]
    M = B * S

    # MXU-width-matched row tile (256 fills v6e/v7x 2x256x256; multiple of 128
    # for v5e's 4x128x128), clamped for tiny problems, always a multiple of 8.
    tm = max(8, min(_round_up(tm, 8), _round_up(M, 8)))

    # Pad M up to a whole number of tiles; keep the tile count even when >1 so
    # v7x megacore sharding gives both TensorCores equal row-tile counts.
    n_tiles = -(-M // tm)
    if n_tiles > 1 and n_tiles % 2 == 1:
        n_tiles += 1
    M_pad = n_tiles * tm

    # bf16 activations + weights at the HBM boundary: halves streaming DMA
    # bytes; the kernel consumed bf16 MXU operands anyway.
    x2 = x.reshape(M, D).astype(jnp.bfloat16)
    if M_pad != M:
        x2 = jnp.pad(x2, ((0, M_pad - M), (0, 0)))
    wa_bf = wa.astype(jnp.bfloat16)
    wb_bf = wb.astype(jnp.bfloat16)

    # Resident-weight VMEM budget (weights counted double-buffered to be safe)
    # + double-buffered streaming x / y tiles + compiler scratch headroom.
    vmem_bytes = (2 * (D * D + D * OUT) * 2        # bf16 Wa, Wb
                  + 2 * (D + 3 * OUT) * 4          # ba, bb, gamma, beta (f32)
                  + 2 * tm * (D + OUT) * 2         # double-buffered x / y tiles
                  + (8 << 20))                     # headroom
    # TODO(synk): if this budget exceeds ~56 MiB (v7x has only 64 MiB VMEM/TC),
    # switch to a K/N-tiled grid with an f32 accumulator scratch instead of
    # keeping Wa/Wb fully resident.
    assert vmem_bytes <= (56 << 20), "weights too large for resident-VMEM path"
    vmem_limit = min(max(vmem_bytes, 32 << 20), 56 << 20)

    cost = pl.CostEstimate(
        flops=2 * M_pad * (D * D + D * OUT),
        transcendentals=M_pad * D,
        bytes_accessed=(M_pad * D * 2 + M_pad * OUT * 2
                        + (D * D + D * OUT) * 2 + (D + 3 * OUT) * 4),
    )

    y2 = pl.pallas_call(
        _ffn_kernel,
        out_shape=jax.ShapeDtypeStruct((M_pad, OUT), out_dtype),
        grid=(n_tiles,),
        in_specs=[
            pl.BlockSpec((tm, D), lambda i: (i, 0)),     # x row-tile (streamed)
            pl.BlockSpec((D, D), lambda i: (0, 0)),      # Wa (resident)
            pl.BlockSpec((1, D), lambda i: (0, 0)),      # ba
            pl.BlockSpec((D, OUT), lambda i: (0, 0)),    # Wb (resident)
            pl.BlockSpec((1, OUT), lambda i: (0, 0)),    # bb
            pl.BlockSpec((1, OUT), lambda i: (0, 0)),    # LN gamma
            pl.BlockSpec((1, OUT), lambda i: (0, 0)),    # LN beta
        ],
        out_specs=pl.BlockSpec((tm, OUT), lambda i: (i, 0)),
        compiler_params=pltpu.CompilerParams(
            dimension_semantics=("parallel",),
            vmem_limit_bytes=vmem_limit),
        cost_estimate=cost,
    )(x2, wa_bf, ba, wb_bf, bb, gamma, beta)

    return y2[:M].reshape(B, S, OUT)


def ffn_forward(x, params):
    """Matches FFN.forward: y is computed by the fused kernel but the module
    returns its input x unchanged.  y is returned as an auxiliary so the Pallas
    compute is observable / not dead-code eliminated."""
    # TODO(synk): FFN.forward is a semantic identity in the reference; y is dead.
    y = ffn_apply(x, *params)
    return x, y


def _ffn_ref(x, wa, ba, wb, bb, gamma, beta):
    """Pure-JAX f32 reference (tanh GELU, torch-default LayerNorm)."""
    h = x @ wa + ba
    c = 0.7978845608028654
    h = 0.5 * h * (1.0 + jnp.tanh(c * (h + 0.044715 * h ** 3)))
    y = h @ wb + bb
    mean = jnp.mean(y, axis=-1, keepdims=True)
    var = jnp.mean((y - mean) ** 2, axis=-1, keepdims=True)
    return (y - mean) / jnp.sqrt(var + 1e-5) * gamma + beta + y


if __name__ == "__main__":
    # Small but MXU-meaningful feature width (>=256 per review); M=B*S stays tiny.
    B, S, SIZE, OUTSIZE = 2, 8, 256, 256
    key = jax.random.PRNGKey(0)
    ks = jax.random.split(key, 5)
    bound = 1.0 / math.sqrt(SIZE)

    # nn.Linear-style uniform init, weights stored as (in, out) = W^T
    wa = jax.random.uniform(ks[0], (SIZE, SIZE), jnp.float32, -bound, bound)
    ba = jax.random.uniform(ks[1], (1, SIZE), jnp.float32, -bound, bound)
    wb = jax.random.uniform(ks[2], (SIZE, OUTSIZE), jnp.float32, -bound, bound)
    bb = jax.random.uniform(ks[3], (1, OUTSIZE), jnp.float32, -bound, bound)
    gamma = jnp.ones((1, OUTSIZE), jnp.float32)
    beta = jnp.zeros((1, OUTSIZE), jnp.float32)

    x = jax.random.normal(ks[4], (B, S, SIZE), jnp.float32)

    out, y = ffn_forward(x, (wa, ba, wb, bb, gamma, beta))
    jax.block_until_ready((out, y))

    assert out.shape == (B, S, SIZE) and y.shape == (B, S, OUTSIZE)
    assert bool(jnp.all(out == x))            # forward returns its input

    # Correctness of the fused compute path vs. a pure-JAX f32 reference
    # (tolerances account for bf16 MXU operands and the bf16 y output).
    y_ref = _ffn_ref(x, wa, ba, wb, bb, gamma, beta)
    assert bool(jnp.all(jnp.isfinite(y)))
    assert bool(jnp.allclose(y.astype(jnp.float32), y_ref, atol=5e-2, rtol=5e-2))

    print("KERNEL_OK")
</pallas_src>

<mosaic_0001>
module attributes {stable_mosaic.version = 11 : i64} {
  func.func @_ffn_kernel(%arg0: i32, %arg1: memref<16x256xbf16, #tpu.memory_space<vmem>>, %arg2: memref<256x256xbf16, #tpu.memory_space<vmem>>, %arg3: memref<1x256xf32, #tpu.memory_space<vmem>>, %arg4: memref<256x256xbf16, #tpu.memory_space<vmem>>, %arg5: memref<1x256xf32, #tpu.memory_space<vmem>>, %arg6: memref<1x256xf32, #tpu.memory_space<vmem>>, %arg7: memref<1x256xf32, #tpu.memory_space<vmem>>, %arg8: memref<16x256xbf16, #tpu.memory_space<vmem>>) attributes {dimension_semantics = [#tpu.dimension_semantics<parallel>], iteration_bounds = array<i64: 1>, scalar_prefetch = 0 : i64, scratch_operands = 0 : i64, tpu.core_type = #tpu.core_type<tc>, window_params = [{transform_indices = @transform_0, window_bounds = array<i64: 16, 256>}, {pipeline_mode = #tpu.pipeline_mode<synchronous>, transform_indices = @transform_1, window_bounds = array<i64: 256, 256>}, {pipeline_mode = #tpu.pipeline_mode<synchronous>, transform_indices = @transform_2, window_bounds = array<i64: 1, 256>}, {pipeline_mode = #tpu.pipeline_mode<synchronous>, transform_indices = @transform_3, window_bounds = array<i64: 256, 256>}, {pipeline_mode = #tpu.pipeline_mode<synchronous>, transform_indices = @transform_4, window_bounds = array<i64: 1, 256>}, {pipeline_mode = #tpu.pipeline_mode<synchronous>, transform_indices = @transform_5, window_bounds = array<i64: 1, 256>}, {pipeline_mode = #tpu.pipeline_mode<synchronous>, transform_indices = @transform_6, window_bounds = array<i64: 1, 256>}, {transform_indices = @transform_7, window_bounds = array<i64: 16, 256>}]} {
    %c0 = arith.constant 0 : index
    %c0_0 = arith.constant 0 : index
    %0 = vector.load %arg1[%c0, %c0_0] : memref<16x256xbf16, #tpu.memory_space<vmem>>, vector<16x256xbf16>
    %c0_1 = arith.constant 0 : index
    %c0_2 = arith.constant 0 : index
    %1 = vector.load %arg2[%c0_1, %c0_2] : memref<256x256xbf16, #tpu.memory_space<vmem>>, vector<256x256xbf16>
    %cst = arith.constant dense<0.000000e+00> : vector<16x256xf32>
    %2 = tpu.matmul %0, %1, %cst {dimension_numbers = #tpu.dot_dimension_numbers<[1], [0], [0], [1], [0, 0, 1, 1], [], []>} : vector<16x256xbf16>, vector<256x256xbf16>, vector<16x256xf32> -> vector<16x256xf32>
    %c0_3 = arith.constant 0 : index
    %c0_4 = arith.constant 0 : index
    %3 = vector.load %arg3[%c0_3, %c0_4] : memref<1x256xf32, #tpu.memory_space<vmem>>, vector<1x256xf32>
    %4 = vector.broadcast %3 : vector<1x256xf32> to vector<16x256xf32>
    %5 = arith.addf %2, %4 : vector<16x256xf32>
    %6 = arith.mulf %5, %5 : vector<16x256xf32>
    %cst_5 = arith.constant 0.797884583 : f32
    %7 = vector.broadcast %cst_5 : f32 to vector<16x256xf32>
    %8 = arith.mulf %7, %5 : vector<16x256xf32>
    %cst_6 = arith.constant 4.471500e-02 : f32
    %9 = vector.broadcast %cst_6 : f32 to vector<16x256xf32>
    %10 = arith.mulf %9, %6 : vector<16x256xf32>
    %cst_7 = arith.constant 1.000000e+00 : f32
    %11 = vector.broadcast %cst_7 : f32 to vector<16x256xf32>
    %12 = arith.addf %11, %10 : vector<16x256xf32>
    %13 = arith.mulf %8, %12 : vector<16x256xf32>
    %cst_8 = arith.constant 5.000000e-01 : f32
    %14 = vector.broadcast %cst_8 : f32 to vector<16x256xf32>
    %15 = arith.mulf %14, %5 : vector<16x256xf32>
    %16 = math.tanh %13 : vector<16x256xf32>
    %cst_9 = arith.constant 1.000000e+00 : f32
    %17 = vector.broadcast %cst_9 : f32 to vector<16x256xf32>
    %18 = arith.addf %17, %16 : vector<16x256xf32>
    %19 = arith.mulf %15, %18 : vector<16x256xf32>
    %20 = arith.truncf %19 : vector<16x256xf32> to vector<16x256xbf16>
    %c0_10 = arith.constant 0 : index
    %c0_11 = arith.constant 0 : index
    %21 = vector.load %arg4[%c0_10, %c0_11] : memref<256x256xbf16, #tpu.memory_space<vmem>>, vector<256x256xbf16>
    %cst_12 = arith.constant dense<0.000000e+00> : vector<16x256xf32>
    %22 = tpu.matmul %20, %21, %cst_12 {dimension_numbers = #tpu.dot_dimension_numbers<[1], [0], [0], [1], [0, 0, 1, 1], [], []>} : vector<16x256xbf16>, vector<256x256xbf16>, vector<16x256xf32> -> vector<16x256xf32>
    %c0_13 = arith.constant 0 : index
    %c0_14 = arith.constant 0 : index
    %23 = vector.load %arg5[%c0_13, %c0_14] : memref<1x256xf32, #tpu.memory_space<vmem>>, vector<1x256xf32>
    %24 = vector.broadcast %23 : vector<1x256xf32> to vector<16x256xf32>
    %25 = arith.addf %22, %24 : vector<16x256xf32>
    %cst_15 = arith.constant dense<0.000000e+00> : vector<16xf32>
    %26 = vector.multi_reduction <add>, %25, %cst_15 [1] : vector<16x256xf32> to vector<16xf32>
    %27 = vector.shape_cast %26 : vector<16xf32> to vector<16x1xf32>
    %cst_16 = arith.constant 2.560000e+02 : f32
    %28 = vector.broadcast %cst_16 : f32 to vector<16x1xf32>
    %29 = arith.divf %27, %28 : vector<16x1xf32>
    %30 = arith.mulf %25, %25 : vector<16x256xf32>
    %cst_17 = arith.constant dense<0.000000e+00> : vector<16xf32>
    %31 = vector.multi_reduction <add>, %30, %cst_17 [1] : vector<16x256xf32> to vector<16xf32>
    %32 = vector.shape_cast %31 : vector<16xf32> to vector<16x1xf32>
    %cst_18 = arith.constant 2.560000e+02 : f32
    %33 = vector.broadcast %cst_18 : f32 to vector<16x1xf32>
    %34 = arith.divf %32, %33 : vector<16x1xf32>
    %35 = arith.mulf %29, %29 : vector<16x1xf32>
    %36 = arith.subf %34, %35 : vector<16x1xf32>
    %cst_19 = arith.constant 0.000000e+00 : f32
    %37 = vector.broadcast %cst_19 : f32 to vector<16x1xf32>
    %38 = arith.maximumf %36, %37 : vector<16x1xf32>
    %39 = vector.broadcast %29 : vector<16x1xf32> to vector<16x256xf32>
    %40 = arith.subf %25, %39 : vector<16x256xf32>
    %cst_20 = arith.constant 9.99999974E-6 : f32
    %41 = vector.broadcast %cst_20 : f32 to vector<16x1xf32>
    %42 = arith.addf %38, %41 : vector<16x1xf32>
    %43 = math.rsqrt %42 : vector<16x1xf32>
    %44 = vector.broadcast %43 : vector<16x1xf32> to vector<16x256xf32>
    %45 = arith.mulf %40, %44 : vector<16x256xf32>
    %c0_21 = arith.constant 0 : index
    %c0_22 = arith.constant 0 : index
    %46 = vector.load %arg6[%c0_21, %c0_22] : memref<1x256xf32, #tpu.memory_space<vmem>>, vector<1x256xf32>
    %47 = vector.broadcast %46 : vector<1x256xf32> to vector<16x256xf32>
    %48 = arith.mulf %45, %47 : vector<16x256xf32>
    %c0_23 = arith.constant 0 : index
    %c0_24 = arith.constant 0 : index
    %49 = vector.load %arg7[%c0_23, %c0_24] : memref<1x256xf32, #tpu.memory_space<vmem>>, vector<1x256xf32>
    %50 = vector.broadcast %49 : vector<1x256xf32> to vector<16x256xf32>
    %51 = arith.addf %48, %50 : vector<16x256xf32>
    %52 = arith.addf %51, %25 : vector<16x256xf32>
    %53 = arith.truncf %52 : vector<16x256xf32> to vector<16x256xbf16>
    %c0_25 = arith.constant 0 : index
    %c0_26 = arith.constant 0 : index
    %54 = vector.load %arg8[%c0_25, %c0_26] : memref<16x256xbf16, #tpu.memory_space<vmem>>, vector<16x256xbf16>
    tpu.vector_store %arg8[%c0_25, %c0_26], %53 {strides = array<i32>} : memref<16x256xbf16, #tpu.memory_space<vmem>>, vector<16x256xbf16>,
    return
  }
  func.func @transform_0(%arg0: i32) -> (i32, i32) {
    %c0_i32 = arith.constant 0 : i32
    %c0_i32_0 = arith.constant 0 : i32
    return %arg0, %c0_i32 : i32, i32
  }
  func.func @transform_1(%arg0: i32) -> (i32, i32) {
    %c0_i32 = arith.constant 0 : i32
    %c0_i32_0 = arith.constant 0 : i32
    %c0_i32_1 = arith.constant 0 : i32
    return %c0_i32, %c0_i32_0 : i32, i32
  }
  func.func @transform_2(%arg0: i32) -> (i32, i32) {
    %c0_i32 = arith.constant 0 : i32
    %c0_i32_0 = arith.constant 0 : i32
    %c0_i32_1 = arith.constant 0 : i32
    return %c0_i32, %c0_i32_0 : i32, i32
  }
  func.func @transform_3(%arg0: i32) -> (i32, i32) {
    %c0_i32 = arith.constant 0 : i32
    %c0_i32_0 = arith.constant 0 : i32
    %c0_i32_1 = arith.constant 0 : i32
    return %c0_i32, %c0_i32_0 : i32, i32
  }
  func.func @transform_4(%arg0: i32) -> (i32, i32) {
    %c0_i32 = arith.constant 0 : i32
    %c0_i32_0 = arith.constant 0 : i32
    %c0_i32_1 = arith.constant 0 : i32
    return %c0_i32, %c0_i32_0 : i32, i32
  }
  func.func @transform_5(%arg0: i32) -> (i32, i32) {
    %c0_i32 = arith.constant 0 : i32
    %c0_i32_0 = arith.constant 0 : i32
    %c0_i32_1 = arith.constant 0 : i32
    return %c0_i32, %c0_i32_0 : i32, i32
  }
  func.func @transform_6(%arg0: i32) -> (i32, i32) {
    %c0_i32 = arith.constant 0 : i32
    %c0_i32_0 = arith.constant 0 : i32
    %c0_i32_1 = arith.constant 0 : i32
    return %c0_i32, %c0_i32_0 : i32, i32
  }
  func.func @transform_7(%arg0: i32) -> (i32, i32) {
    %c0_i32 = arith.constant 0 : i32
    %c0_i32_0 = arith.constant 0 : i32
    return %arg0, %c0_i32 : i32, i32
  }
}

</mosaic_0001>

<bundles_post_ra>
// kernel: tpu_custom_call.1
= control target key start
LH: loop header
LB: loop body
LE: loop exit
PB: predicated region body
PF: predicated region fallthrough
CT: control target
= control target key end

     0   :  { %12 = vsyncpa [#allocation3], 0  ;;  %s1393_s0 = inlined_call_operand.hbm [shape: bf16[16,256], index: 0, kind: input, shape index: {}]   ;;  %s1394_s1 = inlined_call_operand.hbm [shape: bf16[256,256], index: 1, kind: input, shape index: {}]   ;;  %s1395_s2 = inlined_call_operand.hbm [shape: f32[1,256], index: 2, kind: input, shape index: {}]   ;;  %s1396_s3 = inlined_call_operand.hbm [shape: bf16[256,256], index: 3, kind: input, shape index: {}]   ;;  %s1397_s4 = inlined_call_operand.vmem [shape: f32[1,256], index: 4, kind: input, shape index: {}]   ;;  %s1398_s5 = inlined_call_operand.vmem [shape: f32[1,256], index: 5, kind: input, shape index: {}]   ;;  %s1399_s6 = inlined_call_operand.hbm [shape: f32[1,256], index: 6, kind: input, shape index: {}]   ;;  %s1400_s7 = inlined_call_operand.hbm [shape: bf16[16,256], index: 7, kind: output, shape index: {}]  }
   0x1   :  { %13 = vsyncpa [#allocation6], 0 }
   0x2   :  { %14 = vsyncpa [#allocation9], 0 }
   0x3   :  { %15 = vsyncpa [#allocation4], 0  ;;  %s33_s26 = sshll.u32 %s1394_s1, 4  ;;  %s1276_s27 = smov [#allocation5]   ;;  %s34_s26 = int_to_ptr.hbm [resolvable:$true] %s33_s26 }
   0x4   :  { %s35_s28 = sshll.u32 %s1276_s27, 4  ;;  %s57_s8 = sshll.u32 %s1396_s3, 4  ;;  %s36_s28 = int_to_ptr.vmem [resolvable:$true] %s35_s28  ;;  %s58_s8 = int_to_ptr.hbm [resolvable:$true] %s57_s8 }
   0x5   :  { %s1277_s9 = smov 128   ;;  %s1278_s10 = smov 8  }
   0x6   :  { %41 = dma.hbm_to_vmem [thread:$0]  %s34_s26, 4096, %s36_s28, [#allocation6], %s1277_s9, %s1277_s9, %s1278_s10  }
   0x7   :  { %s1279_s11 = smov [#allocation8]   ;;  %s20_s1 = sshll.u32 %s1393_s0, 4  ;;  %s21_s1 = int_to_ptr.hbm [resolvable:$true] %s20_s1 }
   0x8   :  { %s59_s12 = sshll.u32 %s1279_s11, 4  ;;  %s47_s16 = sshll.u32 %s1395_s2, 4  ;;  %s60_s12 = int_to_ptr.vmem [resolvable:$true] %s59_s12  ;;  %s48_s16 = int_to_ptr.hbm [resolvable:$true] %s47_s16 }
   0x9   :  { %65 = dma.hbm_to_vmem [thread:$0]  %s58_s8, 4096, %s60_s12, [#allocation9], %s1277_s9, %s1277_s9, %s1278_s10  }
   0xa   :  { %s1280_s17 = smov [#allocation2]   ;;  %s1281_s19 = smov [#allocation7]  }
   0xb   :  { %s22_s18 = sshll.u32 %s1280_s17, 4  ;;  %s49_s0 = sshll.u32 %s1281_s19, 4  ;;  %s23_s18 = int_to_ptr.vmem [resolvable:$true] %s22_s18  ;;  %s50_s0 = int_to_ptr.vmem [resolvable:$true] %s49_s0 }
   0xc   :  { %28 = dma.hbm_to_vmem [thread:$0]  %s21_s1, 256, %s23_s18, [#allocation3], %s1277_s9, %s1277_s9, %s1278_s10  }
   0xd   :  { %s75_s22 = sshll.u32 %s1399_s6, 4  ;;  %s1282_s23 = smov [#allocation10]   ;;  %s76_s22 = int_to_ptr.hbm [resolvable:$true] %s75_s22 }
   0xe   :  { %52 = dma.hbm_to_vmem [thread:$0]  %s48_s16, 32, %s50_s0, [#allocation6]  }
   0xf   :  { %s77_s24 = sshll.u32 %s1282_s23, 4  ;;  %s78_s24 = int_to_ptr.vmem [resolvable:$true] %s77_s24 }
  0x10   :  { %80 = dma.hbm_to_vmem [thread:$0]  %s76_s22, 32, %s78_s24, [#allocation9]  }
  0x11   :  { %1268 = dma.done.wait [#allocation3], 256  }
  0x12   :  { %1269 = vsyncadd [#allocation3], 4294967040 }
  0x13   :  { %1270 = dma.done.wait [#allocation6], 4128  }
  0x14   :  { %1271 = vsyncadd [#allocation6], 4294963168 }
  0x15   :  { %1272 = dma.done.wait [#allocation9], 4128  }
  0x16   :  { %1273 = vsyncadd [#allocation9], 4294963168  ;;  %v837_v0 = vld [vmem:[#allocation5 + $0x70] sm:$0xf]  ;;  %v1052_v1 = vld [vmem:[#allocation5 + $0x74] sm:$0xf0] }
  0x17   :  { %v901_v2 = vld [vmem:[#allocation5 + $0xf0] sm:$0xf]  ;;  %v838_v3 = vor.u32 %v1052_v1, %v837_v0  ;;  %v1068_v4 = vld [vmem:[#allocation5 + $0xf4] sm:$0xf0]  ;;  %v1051_v5 = vld [vmem:[#allocation5 + $0x74] sm:$0xf] }
  0x18   :  { %v839_v6 = vld [vmem:[#allocation5 + $0x78] sm:$0xf0]  ;;  %v902_v7 = vor.u32 %v1068_v4, %v901_v2  ;;  %v1067_v9 = vld [vmem:[#allocation5 + $0xf4] sm:$0xf]  ;;  %v829_v11 = vld [vmem:[#allocation5 + $0x60] sm:$0xf] }
  0x19   :  { %v842_v8 = vor.u32 %v1051_v5, %v839_v6  ;;  %v903_v10 = vld [vmem:[#allocation5 + $0xf8] sm:$0xf0]  ;;  %311 = vmatpush.bf16.msra.mxu0 %v838_v3  ;;  %v1050_v13 = vld [vmem:[#allocation5 + $0x64] sm:$0xf0]  ;;  %v893_v14 = vld [vmem:[#allocation5 + $0xe0] sm:$0xf] }
  0x1a   :  { %v906_v12 = vor.u32 %v1067_v9, %v903_v10  ;;  %v1066_v15 = vld [vmem:[#allocation5 + $0xe4] sm:$0xf0]  ;;  %325 = vmatpush.bf16.msra.mxu1 %v902_v7  ;;  %v830_v16 = vor.u32 %v1050_v13, %v829_v11  ;;  %v1049_v18 = vld [vmem:[#allocation5 + $0x64] sm:$0xf]  ;;  %v831_v19 = vld [vmem:[#allocation5 + $0x68] sm:$0xf0] }
  0x1b   :  { %339 = vmatpush.bf16.msra.mxu2 %v842_v8  ;;  %v894_v17 = vor.u32 %v1066_v15, %v893_v14  ;;  %v1065_v20 = vld [vmem:[#allocation5 + $0xe4] sm:$0xf]  ;;  %v834_v21 = vor.u32 %v1049_v18, %v831_v19  ;;  %v895_v22 = vld [vmem:[#allocation5 + $0xe8] sm:$0xf0]  ;;  %v821_v23 = vld [vmem:[#allocation5 + $0x50] sm:$0xf] }
  0x1c   :  { %353 = vmatpush.bf16.msra.mxu3 %v906_v12  ;;  %v1048_v24 = vld [vmem:[#allocation5 + $0x54] sm:$0xf0]  ;;  %v898_v25 = vor.u32 %v1065_v20, %v895_v22  ;;  %v885_v26 = vld [vmem:[#allocation5 + $0xd0] sm:$0xf]  ;;  %v1047_v28 = vld [vmem:[#allocation5 + $0x54] sm:$0xf] }
  0x1d   :  { %v1064_v27 = vld [vmem:[#allocation5 + $0xd4] sm:$0xf0]  ;;  %312 = vmatpush.bf16.msra.mxu0 %v830_v16  ;;  %v822_v29 = vor.u32 %v1048_v24, %v821_v23  ;;  %v823_v30 = vld [vmem:[#allocation5 + $0x58] sm:$0xf0]  ;;  %v1063_v31 = vld [vmem:[#allocation5 + $0xd4] sm:$0xf] }
  0x1e   :  { %v887_v32 = vld [vmem:[#allocation5 + $0xd8] sm:$0xf0]  ;;  %326 = vmatpush.bf16.msra.mxu1 %v894_v17  ;;  %v886_v33 = vor.u32 %v1064_v27, %v885_v26  ;;  %v826_v34 = vor.u32 %v1047_v28, %v823_v30  ;;  %v813_v35 = vld [vmem:[#allocation5 + $0x40] sm:$0xf]  ;;  %v1046_v36 = vld [vmem:[#allocation5 + $0x44] sm:$0xf0] }
  0x1f   :  { %340 = vmatpush.bf16.msra.mxu2 %v834_v21  ;;  %v877_v37 = vld [vmem:[#allocation5 + $0xc0] sm:$0xf]  ;;  %v890_v38 = vor.u32 %v1063_v31, %v887_v32  ;;  %v1062_v39 = vld [vmem:[#allocation5 + $0xc4] sm:$0xf0]  ;;  %v1045_v40 = vld [vmem:[#allocation5 + $0x44] sm:$0xf]  ;;  %v814_v44 = vor.u32 %v1046_v36, %v813_v35 }
  0x20   :  { %354 = vmatpush.bf16.msra.mxu3 %v898_v25  ;;  %v815_v41 = vld [vmem:[#allocation5 + $0x48] sm:$0xf0]  ;;  %v1061_v42 = vld [vmem:[#allocation5 + $0xc4] sm:$0xf]  ;;  %v878_v45 = vor.u32 %v1062_v39, %v877_v37  ;;  %v805_v47 = vld [vmem:[#allocation5 + $0x30] sm:$0xf] }
  0x21   :  { %v879_v43 = vld [vmem:[#allocation5 + $0xc8] sm:$0xf0]  ;;  %313 = vmatpush.bf16.msra.mxu0 %v822_v29  ;;  %v818_v46 = vor.u32 %v1045_v40, %v815_v41  ;;  %v1044_v48 = vld [vmem:[#allocation5 + $0x34] sm:$0xf0]  ;;  %v869_v49 = vld [vmem:[#allocation5 + $0xb0] sm:$0xf] }
  0x22   :  { %327 = vmatpush.bf16.msra.mxu1 %v886_v33  ;;  %v882_v50 = vor.u32 %v1061_v42, %v879_v43  ;;  %v1060_v51 = vld [vmem:[#allocation5 + $0xb4] sm:$0xf0]  ;;  %v1043_v52 = vld [vmem:[#allocation5 + $0x34] sm:$0xf]  ;;  %v807_v53 = vld [vmem:[#allocation5 + $0x38] sm:$0xf0]  ;;  %v806_v56 = vor.u32 %v1044_v48, %v805_v47 }
  0x23   :  { %341 = vmatpush.bf16.msra.mxu2 %v826_v34  ;;  %v1059_v54 = vld [vmem:[#allocation5 + $0xb4] sm:$0xf]  ;;  %v871_v55 = vld [vmem:[#allocation5 + $0xb8] sm:$0xf0]  ;;  %v870_v57 = vor.u32 %v1060_v51, %v869_v49  ;;  %v810_v58 = vor.u32 %v1043_v52, %v807_v53  ;;  %v797_v59 = vld [vmem:[#allocation5 + $0x20] sm:$0xf] }
  0x24   :  { %355 = vmatpush.bf16.msra.mxu3 %v890_v38  ;;  %v1042_v60 = vld [vmem:[#allocation5 + $0x24] sm:$0xf0]  ;;  %v861_v61 = vld [vmem:[#allocation5 + $0xa0] sm:$0xf]  ;;  %v874_v62 = vor.u32 %v1059_v54, %v871_v55  ;;  %v1041_v0 = vld [vmem:[#allocation5 + $0x24] sm:$0xf] }
  0x25   :  { %314 = vmatpush.bf16.msra.mxu0 %v814_v44  ;;  %v1058_v63 = vld [vmem:[#allocation5 + $0xa4] sm:$0xf0]  ;;  %v799_v1 = vld [vmem:[#allocation5 + $0x28] sm:$0xf0]  ;;  %v1057_v2 = vld [vmem:[#allocation5 + $0xa4] sm:$0xf]  ;;  %v798_v4 = vor.u32 %v1042_v60, %v797_v59 }
  0x26   :  { %328 = vmatpush.bf16.msra.mxu1 %v878_v45  ;;  %v863_v3 = vld [vmem:[#allocation5 + $0xa8] sm:$0xf0]  ;;  %v862_v5 = vor.u32 %v1058_v63, %v861_v61  ;;  %v802_v6 = vor.u32 %v1041_v0, %v799_v1  ;;  %v789_v7 = vld [vmem:[#allocation5 + $0x10] sm:$0xf]  ;;  %v1040_v8 = vld [vmem:[#allocation5 + $0x14] sm:$0xf0] }
  0x27   :  { %342 = vmatpush.bf16.msra.mxu2 %v818_v46  ;;  %v853_v9 = vld [vmem:[#allocation5 + $0x90] sm:$0xf]  ;;  %v866_v10 = vor.u32 %v1057_v2, %v863_v3  ;;  %v1056_v11 = vld [vmem:[#allocation5 + $0x94] sm:$0xf0]  ;;  %v1039_v12 = vld [vmem:[#allocation5 + $0x14] sm:$0xf]  ;;  %v790_v16 = vor.u32 %v1040_v8, %v789_v7 }
  0x28   :  { %356 = vmatpush.bf16.msra.mxu3 %v882_v50  ;;  %v791_v13 = vld [vmem:[#allocation5 + $0x18] sm:$0xf0]  ;;  %v1055_v14 = vld [vmem:[#allocation5 + $0x94] sm:$0xf]  ;;  %v854_v17 = vor.u32 %v1056_v11, %v853_v9  ;;  %v781_v19 = vld [vmem:[#allocation5] sm:$0xf] }
  0x29   :  { %315 = vmatpush.bf16.msra.mxu0 %v806_v56  ;;  %v855_v15 = vld [vmem:[#allocation5 + $0x98] sm:$0xf0]  ;;  %v794_v18 = vor.u32 %v1039_v12, %v791_v13  ;;  %v1038_v20 = vld [vmem:[#allocation5 + $0x4] sm:$0xf0]  ;;  %v845_v21 = vld [vmem:[#allocation5 + $0x80] sm:$0xf] }
  0x2a   :  { %329 = vmatpush.bf16.msra.mxu1 %v870_v57  ;;  %v858_v22 = vor.u32 %v1055_v14, %v855_v15  ;;  %v1054_v23 = vld [vmem:[#allocation5 + $0x84] sm:$0xf0]  ;;  %v1037_v24 = vld [vmem:[#allocation5 + $0x4] sm:$0xf]  ;;  %v783_v25 = vld [vmem:[#allocation5 + $0x8] sm:$0xf0]  ;;  %v782_v28 = vor.u32 %v1038_v20, %v781_v19 }
  0x2b   :  { %343 = vmatpush.bf16.msra.mxu2 %v810_v58  ;;  %v1053_v26 = vld [vmem:[#allocation5 + $0x84] sm:$0xf]  ;;  %v847_v27 = vld [vmem:[#allocation5 + $0x88] sm:$0xf0]  ;;  %v773_v29 = vld [vmem:[#allocation2] sm:$0xf]  ;;  %v846_v31 = vor.u32 %v1054_v23, %v845_v21  ;;  %v786_v32 = vor.u32 %v1037_v24, %v783_v25 }
  0x2c   :  { %357 = vmatpush.bf16.msra.mxu3 %v874_v62  ;;  %v1036_v30 = vld [vmem:[#allocation2 + $0x4] sm:$0xf0]  ;;  %v1035_v33 = vld [vmem:[#allocation2 + $0x4] sm:$0xf]  ;;  %v775_v34 = vld [vmem:[#allocation2 + $0x8] sm:$0xf0]  ;;  %v850_v35 = vor.u32 %v1053_v26, %v847_v27 }
  0x2d   :  { %316 = vmatpush.bf16.msra.mxu0 %v798_v4  ;;  %v774_v36 = vor.u32 %v1036_v30, %v773_v29  ;;  %v778_v37 = vor.u32 %v1035_v33, %v775_v34  ;;  %v965_v38 = vld [vmem:[#allocation8 + $0x70] sm:$0xf]  ;;  %v1084_v39 = vld [vmem:[#allocation8 + $0x74] sm:$0xf0]  ;;  %v1083_v40 = vld [vmem:[#allocation8 + $0x74] sm:$0xf] }
  0x2e   :  { %330 = vmatpush.bf16.msra.mxu1 %v862_v5  ;;  %v966_v41 = vor.u32 %v1084_v39, %v965_v38  ;;  %v967_v42 = vld [vmem:[#allocation8 + $0x78] sm:$0xf0]  ;;  %v957_v44 = vld [vmem:[#allocation8 + $0x60] sm:$0xf]  ;;  %v1082_v45 = vld [vmem:[#allocation8 + $0x64] sm:$0xf0] }
  0x2f   :  { %344 = vmatpush.bf16.msra.mxu2 %v802_v6  ;;  %v970_v43 = vor.u32 %v1083_v40, %v967_v42  ;;  %v1081_v46 = vld [vmem:[#allocation8 + $0x64] sm:$0xf]  ;;  %v958_v47 = vor.u32 %v1082_v45, %v957_v44  ;;  %v959_v48 = vld [vmem:[#allocation8 + $0x68] sm:$0xf0]  ;;  %v1029_v50 = vld [vmem:[#allocation8 + $0xf0] sm:$0xf] }
  0x30   :  { %358 = vmatpush.bf16.msra.mxu3 %v866_v10  ;;  %v962_v49 = vor.u32 %v1081_v46, %v959_v48  ;;  %v1100_v51 = vld [vmem:[#allocation8 + $0xf4] sm:$0xf0]  ;;  %v1099_v52 = vld [vmem:[#allocation8 + $0xf4] sm:$0xf]  ;;  %v1031_v54 = vld [vmem:[#allocation8 + $0xf8] sm:$0xf0] }
  0x31   :  { %317 = vmatpush.bf16.msra.mxu0 %v790_v16  ;;  %v1030_v53 = vor.u32 %v1100_v51, %v1029_v50  ;;  %v1034_v55 = vor.u32 %v1099_v52, %v1031_v54  ;;  %v949_v56 = vld [vmem:[#allocation8 + $0x50] sm:$0xf]  ;;  %v1080_v57 = vld [vmem:[#allocation8 + $0x54] sm:$0xf0]  ;;  %v1079_v58 = vld [vmem:[#allocation8 + $0x54] sm:$0xf] }
  0x32   :  { %331 = vmatpush.bf16.msra.mxu1 %v854_v17  ;;  %v950_v59 = vor.u32 %v1080_v57, %v949_v56  ;;  %v951_v60 = vld [vmem:[#allocation8 + $0x58] sm:$0xf0]  ;;  %v1021_v62 = vld [vmem:[#allocation8 + $0xe0] sm:$0xf]  ;;  %v1098_v63 = vld [vmem:[#allocation8 + $0xe4] sm:$0xf0] }
  0x33   :  { %345 = vmatpush.bf16.msra.mxu2 %v794_v18  ;;  %v954_v61 = vor.u32 %v1079_v58, %v951_v60  ;;  %v1097_v0 = vld [vmem:[#allocation8 + $0xe4] sm:$0xf]  ;;  %v1022_v1 = vor.u32 %v1098_v63, %v1021_v62  ;;  %v1023_v2 = vld [vmem:[#allocation8 + $0xe8] sm:$0xf0]  ;;  %v941_v4 = vld [vmem:[#allocation8 + $0x40] sm:$0xf] }
  0x34   :  { %359 = vmatpush.bf16.msra.mxu3 %v858_v22  ;;  %v1026_v3 = vor.u32 %v1097_v0, %v1023_v2  ;;  %v1078_v5 = vld [vmem:[#allocation8 + $0x44] sm:$0xf0]  ;;  %v1077_v6 = vld [vmem:[#allocation8 + $0x44] sm:$0xf]  ;;  %v943_v8 = vld [vmem:[#allocation8 + $0x48] sm:$0xf0] }
  0x35   :  { %318 = vmatpush.bf16.msra.mxu0 %v782_v28  ;;  %v942_v7 = vor.u32 %v1078_v5, %v941_v4  ;;  %v946_v9 = vor.u32 %v1077_v6, %v943_v8  ;;  %v1013_v10 = vld [vmem:[#allocation8 + $0xd0] sm:$0xf]  ;;  %v1096_v11 = vld [vmem:[#allocation8 + $0xd4] sm:$0xf0]  ;;  %v1095_v12 = vld [vmem:[#allocation8 + $0xd4] sm:$0xf] }
  0x36   :  { %332 = vmatpush.bf16.msra.mxu1 %v846_v31  ;;  %v1014_v13 = vor.u32 %v1096_v11, %v1013_v10  ;;  %v1015_v14 = vld [vmem:[#allocation8 + $0xd8] sm:$0xf0]  ;;  %v933_v16 = vld [vmem:[#allocation8 + $0x30] sm:$0xf]  ;;  %v1076_v17 = vld [vmem:[#allocation8 + $0x34] sm:$0xf0] }
  0x37   :  { %346 = vmatpush.bf16.msra.mxu2 %v786_v32  ;;  %v1018_v15 = vor.u32 %v1095_v12, %v1015_v14  ;;  %v1075_v18 = vld [vmem:[#allocation8 + $0x34] sm:$0xf]  ;;  %v934_v19 = vor.u32 %v1076_v17, %v933_v16  ;;  %v935_v20 = vld [vmem:[#allocation8 + $0x38] sm:$0xf0]  ;;  %v1005_v22 = vld [vmem:[#allocation8 + $0xc0] sm:$0xf] }
  0x38   :  { %360 = vmatpush.bf16.msra.mxu3 %v850_v35  ;;  %319 = vmatmul.bf16.vlgmr.msra.gmra.mxu0 %v774_v36  ;;  %v938_v21 = vor.u32 %v1075_v18, %v935_v20  ;;  %v1094_v23 = vld [vmem:[#allocation8 + $0xc4] sm:$0xf0]  ;;  %v1093_v24 = vld [vmem:[#allocation8 + $0xc4] sm:$0xf]  ;;  %v1007_v26 = vld [vmem:[#allocation8 + $0xc8] sm:$0xf0] }
  0x39   :  { %333 = vmatmul.bf16.vlgmr.msra.gmra.mxu1 %v778_v37  ;;  %603 = vmatpush.bf16.msrb.mxu0 %v966_v41  ;;  %v1006_v25 = vor.u32 %v1094_v23, %v1005_v22  ;;  %v1010_v27 = vor.u32 %v1093_v24, %v1007_v26  ;;  %v925_v28 = vld [vmem:[#allocation8 + $0x20] sm:$0xf]  ;;  %v1074_v29 = vld [vmem:[#allocation8 + $0x24] sm:$0xf0]  ;;  %v1073_v30 = vld [vmem:[#allocation8 + $0x24] sm:$0xf] }
  0x3a   :  { %347 = vmatmul.bf16.vlgmr.msra.gmra.mxu2 %v774_v36  ;;  %617 = vmatpush.bf16.msrb.mxu1 %v1030_v53  ;;  %v1349_v31 = vld [vmem:[#allocation7] sm:$0x3]  ;;  %v926_v32 = vor.u32 %v1074_v29, %v925_v28  ;;  %v927_v33 = vld [vmem:[#allocation8 + $0x28] sm:$0xf0]  ;;  %v997_v35 = vld [vmem:[#allocation8 + $0xb0] sm:$0xf] }
  0x3b   :  { %361 = vmatmul.bf16.vlgmr.msra.gmra.mxu3 %v778_v37  ;;  %631 = vmatpush.bf16.msrb.mxu2 %v970_v43  ;;  %v930_v34 = vor.u32 %v1073_v30, %v927_v33  ;;  %v1092_v36 = vld [vmem:[#allocation8 + $0xb4] sm:$0xf0]  ;;  %v1091_v37 = vld [vmem:[#allocation8 + $0xb4] sm:$0xf]  ;;  %v999_v39 = vld [vmem:[#allocation8 + $0xb8] sm:$0xf0] }
  0x3c   :  { %645 = vmatpush.bf16.msrb.mxu3 %v1034_v55  ;;  %v998_v38 = vor.u32 %v1092_v36, %v997_v35  ;;  %v1002_v40 = vor.u32 %v1091_v37, %v999_v39  ;;  %v917_v41 = vld [vmem:[#allocation8 + $0x10] sm:$0xf]  ;;  %v1072_v42 = vld [vmem:[#allocation8 + $0x14] sm:$0xf0]  ;;  %v1071_v43 = vld [vmem:[#allocation8 + $0x14] sm:$0xf] }
  0x3d   :  { %604 = vmatpush.bf16.msrb.mxu0 %v958_v47  ;;  %v137_v44 = vperm.slane %v1349_v31, 0  ;;  %v918_v45 = vor.u32 %v1072_v42, %v917_v41  ;;  %v919_v46 = vld [vmem:[#allocation8 + $0x18] sm:$0xf0]  ;;  %v989_v48 = vld [vmem:[#allocation8 + $0xa0] sm:$0xf]  ;;  %v138_v11 = vperm.slane %v1349_v31, 1 }
  0x3e   :  { %618 = vmatpush.bf16.msrb.mxu1 %v1022_v1  ;;  %v922_v47 = vor.u32 %v1071_v43, %v919_v46  ;;  %v1089_v50 = vld [vmem:[#allocation8 + $0xa4] sm:$0xf]  ;;  %v991_v52 = vld [vmem:[#allocation8 + $0xa8] sm:$0xf0]  ;;  %v909_v53 = vld [vmem:[#allocation8] sm:$0xf] }
  0x3f   :  { %632 = vmatpush.bf16.msrb.mxu2 %v962_v49  ;;  %v1090_v49 = vld [vmem:[#allocation8 + $0xa4] sm:$0xf0]  ;;  %v994_v55 = vor.u32 %v1089_v50, %v991_v52  ;;  %v1069_v57 = vld [vmem:[#allocation8 + $0x4] sm:$0xf]  ;;  %v911_v58 = vld [vmem:[#allocation8 + $0x8] sm:$0xf0] }
  0x40   :  { %646 = vmatpush.bf16.msrb.mxu3 %v1026_v3  ;;  %v990_v51 = vor.u32 %v1090_v49, %v989_v48  ;;  %v1070_v54 = vld [vmem:[#allocation8 + $0x4] sm:$0xf0]  ;;  %v914_v60 = vor.u32 %v1069_v57, %v911_v58  ;;  %v1087_v62 = vld [vmem:[#allocation8 + $0x94] sm:$0xf]  ;;  %v983_v63 = vld [vmem:[#allocation8 + $0x98] sm:$0xf0] }
  0x41   :  { %605 = vmatpush.bf16.msrb.mxu0 %v950_v59  ;;  %v910_v56 = vor.u32 %v1070_v54, %v909_v53  ;;  %v981_v59 = vld [vmem:[#allocation8 + $0x90] sm:$0xf]  ;;  %v986_v2 = vor.u32 %v1087_v62, %v983_v63  ;;  %v973_v5 = vld [vmem:[#allocation8 + $0x80] sm:$0xf]  ;;  %v1086_v6 = vld [vmem:[#allocation8 + $0x84] sm:$0xf0] }
  0x42   :  { %619 = vmatpush.bf16.msrb.mxu1 %v1014_v13  ;;  %v975_v10 = vld [vmem:[#allocation8 + $0x88] sm:$0xf0]  ;;  %s756_s29 = sshll.u32 %s1400_s7, 4  ;;  %s757_s29 = int_to_ptr.hbm [resolvable:$true] %s756_s29 }
  0x43   :  { %633 = vmatpush.bf16.msrb.mxu2 %v954_v61  ;;  %v1088_v61 = vld [vmem:[#allocation8 + $0x94] sm:$0xf0]  ;;  %v437_v63 = vld [vmem:[%s1397_s4] sm:$0x3] }
  0x44   :  { %647 = vmatpush.bf16.msrb.mxu3 %v1018_v15  ;;  %v982_v1 = vor.u32 %v1088_v61, %v981_v59 }
  0x45   :  { %606 = vmatpush.bf16.msrb.mxu0 %v942_v7  ;;  %v1085_v7 = vld [vmem:[#allocation8 + $0x84] sm:$0xf] }
  0x46   :  { %620 = vmatpush.bf16.msrb.mxu1 %v1006_v25  ;;  %v978_v12 = vor.u32 %v1085_v7, %v975_v10 }
  0x47   :  { %634 = vmatpush.bf16.msrb.mxu2 %v946_v9  ;;  %v974_v9 = vor.u32 %v1086_v6, %v973_v5 }
  0x48   :  { %648 = vmatpush.bf16.msrb.mxu3 %v1010_v27 }
  0x49   :  { %607 = vmatpush.bf16.msrb.mxu0 %v934_v19 }
  0x4a   :  { %621 = vmatpush.bf16.msrb.mxu1 %v998_v38 }
  0x4b   :  { %635 = vmatpush.bf16.msrb.mxu2 %v938_v21 }
  0x4c   :  { %649 = vmatpush.bf16.msrb.mxu3 %v1002_v40 }
  0x4d   :  { %608 = vmatpush.bf16.msrb.mxu0 %v926_v32 }
  0x4e   :  { %622 = vmatpush.bf16.msrb.mxu1 %v990_v51 }
  0x4f   :  { %636 = vmatpush.bf16.msrb.mxu2 %v930_v34 }
  0x50   :  { %650 = vmatpush.bf16.msrb.mxu3 %v994_v55 }
  0x51   :  { %609 = vmatpush.bf16.msrb.mxu0 %v918_v45 }
  0x52   :  { %623 = vmatpush.bf16.msrb.mxu1 %v982_v1  ;;  %v439_v1 = vperm.slane %v437_v63, 0 }
  0x53   :  { %637 = vmatpush.bf16.msrb.mxu2 %v922_v47 }
  0x54   :  { %651 = vmatpush.bf16.msrb.mxu3 %v986_v2 }
  0x55   :  { %610 = vmatpush.bf16.msrb.mxu0 %v910_v56 }
  0x56   :  { %624 = vmatpush.bf16.msrb.mxu1 %v974_v9 }
  0x57   :  { %638 = vmatpush.bf16.msrb.mxu2 %v914_v60 }
  0x58   :  { %652 = vmatpush.bf16.msrb.mxu3 %v978_v12 }
  0xb5   :  { %v320_v0 = vpop.f32.mrf.mxu0 }
  0xb6   :  { %v321_v3 = vadd.f32 %v320_v0, %v137_v44  ;;  %v334_v4 = vpop.f32.mrf.mxu1 }
  0xb8   :  { %v335_v8 = vadd.f32 %v334_v4, %v321_v3  ;;  %v440_v4 = vperm.slane %v437_v63, 1 }
  0xba   :  { %v367_v13 = vmul.f32 %v335_v8, %v335_v8  ;;  %v371_v19 = vmul.f32 0.7978846, %v335_v8  ;;  %v387_v48 = vmul.f32 0.5, %v335_v8 }
  0xbc   :  { %v375_v14 = vmul.f32 0.044715, %v367_v13 }
  0xbd   :  { %v348_v15 = vpop.f32.mrf.mxu2  ;;  %v322_v18 = vpop.f32.mrf.mxu0 }
  0xbe   :  { %v349_v16 = vadd.f32 %v348_v15, %v138_v11  ;;  %v362_v17 = vpop.f32.mrf.mxu3  ;;  %v379_v20 = vadd.f32 1.0, %v375_v14  ;;  %v323_v21 = vadd.f32 %v322_v18, %v137_v44  ;;  %v336_v23 = vpop.f32.mrf.mxu1 }
  0xc0   :  { %v363_v22 = vadd.f32 %v362_v17, %v349_v16  ;;  %v337_v24 = vadd.f32 %v336_v23, %v323_v21  ;;  %v383_v26 = vmul.f32 %v379_v20, %v371_v19 }
  0xc2   :  { %v368_v25 = vmul.f32 %v363_v22, %v363_v22  ;;  %v369_v27 = vmul.f32 %v337_v24, %v337_v24  ;;  %1110 = vtanh.f32 %v383_v26  ;;  %v373_v33 = vmul.f32 0.7978846, %v337_v24 }
  0xc3   :  { %v372_v36 = vmul.f32 0.7978846, %v363_v22  ;;  %v389_v49 = vmul.f32 0.5, %v337_v24  ;;  %v388_v57 = vmul.f32 0.5, %v363_v22  ;;  %v1283_v26 = vmov 256.0  }
  0xc4   :  { %v376_v28 = vmul.f32 0.044715, %v368_v25  ;;  %v377_v29 = vmul.f32 0.044715, %v369_v27 }
  0xc5   :  { %v350_v30 = vpop.f32.mrf.mxu2 }
  0xc6   :  { %v380_v31 = vadd.f32 1.0, %v376_v28  ;;  %v351_v32 = vadd.f32 %v350_v30, %v138_v11  ;;  %v381_v34 = vadd.f32 1.0, %v377_v29  ;;  %v364_v35 = vpop.f32.mrf.mxu3 }
  0xc8   :  { %v365_v37 = vadd.f32 %v364_v35, %v351_v32  ;;  %v385_v38 = vmul.f32 %v381_v34, %v373_v33  ;;  %v384_v39 = vmul.f32 %v380_v31, %v372_v36  ;;  %v1111_v42 = vpop.eup %1110 }
  0xc9   :  { %v395_v46 = vadd.f32 1.0, %v1111_v42 }
  0xca   :  { %v370_v40 = vmul.f32 %v365_v37, %v365_v37  ;;  %1112 = vtanh.f32 %v385_v38  ;;  %v374_v43 = vmul.f32 0.7978846, %v365_v37  ;;  %v390_v58 = vmul.f32 0.5, %v365_v37 }
  0xcb   :  { %1114 = vtanh.f32 %v384_v39  ;;  %v399_v52 = vmul.f32 %v395_v46, %v387_v48 }
  0xcc   :  { %v378_v41 = vmul.f32 0.044715, %v370_v40 }
  0xce   :  { %v382_v44 = vadd.f32 1.0, %v378_v41 }
  0xd0   :  { %v386_v45 = vmul.f32 %v382_v44, %v374_v43  ;;  %v1113_v47 = vpop.eup %1112 }
  0xd1   :  { %v397_v50 = vadd.f32 1.0, %v1113_v47  ;;  %v1115_v51 = vpop.eup %1114 }
  0xd2   :  { %1116 = vtanh.f32 %v386_v45  ;;  %v396_v55 = vadd.f32 1.0, %v1115_v51 }
  0xd3   :  { %v401_v53 = vmul.f32 %v397_v50, %v389_v49  ;;  %1118 = vrcp.f32 %v1283_v26 }
  0xd4   :  { %v400_v60 = vmul.f32 %v396_v55, %v388_v57  ;;  %v732_v55 = vld [vmem:[#allocation10] sm:$0x3] }
  0xd5   :  { %v403_v54 = vpack.c.bf16 %v401_v53, %v399_v52  ;;  %v722_v53 = vld [vmem:[%s1398_s5] sm:$0x3]  ;;  %s1284_s5 = smov [#allocation11]  }
  0xd6   :  { %s754_s26 = sshll.u32 %s1284_s5, 4  ;;  %s755_s26 = int_to_ptr.vmem [resolvable:$true] %s754_s26 }
  0xd7   :  { %611 = vmatmul.bf16.vlgmr.msrb.gmra.mxu0 %v403_v54  ;;  %639 = vmatmul.bf16.vlgmr.msrb.gmra.mxu2 %v403_v54 }
  0xd8   :  { %v1117_v56 = vpop.eup %1116 }
  0xd9   :  { %v398_v59 = vadd.f32 1.0, %v1117_v56  ;;  %v1119_v27 = vpop.eup %1118 }
  0xda   :  { %v666_v28 = vmul.f32 256.0, %v1119_v27  ;;  %vm670_vm0 = vweird.f32 %v1119_v27 }
  0xdb   :  { %v402_v61 = vmul.f32 %v398_v59, %v390_v58  ;;  %v724_v58 = vperm.slane %v722_v53, 0 }
  0xdc   :  { %v667_v29 = vsub.f32 1.0, %v666_v28 }
  0xdd   :  { %v404_v62 = vpack.c.bf16 %v402_v61, %v400_v60 }
  0xde   :  { %v668_v30 = vmul.f32 %v1119_v27, %v667_v29 }
  0xdf   :  { %625 = vmatmul.bf16.vlgmr.msrb.gmra.mxu1 %v404_v62  ;;  %653 = vmatmul.bf16.vlgmr.msrb.gmra.mxu3 %v404_v62  ;;  %v725_v62 = vperm.slane %v722_v53, 1 }
  0xe0   :  { %v669_v31 = vadd.f32 %v1119_v27, %v668_v30 }
  0xe2   :  { %v671_v32 = vsel %vm670_vm0, %v1119_v27, %v669_v31 }
 0x154   :  { %v612_v0 = vpop.f32.mrf.mxu0 }
 0x155   :  { %v613_v5 = vadd.f32 %v612_v0, %v439_v1  ;;  %v734_v0 = vperm.slane %v732_v55, 0 }
 0x15a   :  { %v640_v3 = vpop.f32.mrf.mxu2 }
 0x15b   :  { %v641_v7 = vadd.f32 %v640_v3, %v440_v4 }
 0x15c   :  { %v626_v2 = vpop.f32.mrf.mxu1  ;;  %v614_v10 = vpop.f32.mrf.mxu0 }
 0x15d   :  { %v1356_v6 = vadd.f32 %v626_v2, %v613_v5  ;;  %v615_v16 = vadd.f32 %v614_v10, %v439_v1 }
 0x15f   :  { %v674_v12 = vmul.f32 %v1356_v6, %v1356_v6 }
 0x162   :  { %v654_v8 = vpop.f32.mrf.mxu3  ;;  %v642_v15 = vpop.f32.mrf.mxu2 }
 0x163   :  { %v1358_v9 = vadd.f32 %v654_v8, %v641_v7  ;;  %v643_v19 = vadd.f32 %v642_v15, %v440_v4  ;;  %v735_v4 = vperm.slane %v732_v55, 1 }
 0x164   :  { %v628_v14 = vpop.f32.mrf.mxu1 }
 0x165   :  { %v659_v11 = vadd.f32 %v1358_v9, %v1356_v6  ;;  %v675_v13 = vmul.f32 %v1358_v9, %v1358_v9  ;;  %v1366_v18 = vadd.f32 %v628_v14, %v615_v16 }
 0x167   :  { %660 = vadd.xlane.f32.xlu0 %v659_v11  ;;  %v678_v17 = vadd.f32 %v675_v13, %v674_v12  ;;  %v676_v23 = vmul.f32 %v1366_v18, %v1366_v18 }
 0x169   :  { %679 = vadd.xlane.f32.xlu1 %v678_v17 }
 0x16a   :  { %v656_v20 = vpop.f32.mrf.mxu3 }
 0x16b   :  { %v1368_v21 = vadd.f32 %v656_v20, %v643_v19 }
 0x16d   :  { %v662_v22 = vadd.f32 %v1368_v21, %v1366_v18  ;;  %v677_v24 = vmul.f32 %v1368_v21, %v1368_v21 }
 0x16f   :  { %663 = vadd.xlane.f32.xlu0 %v662_v22  ;;  %v681_v25 = vadd.f32 %v677_v24, %v676_v23 }
 0x171   :  { %682 = vadd.xlane.f32.xlu1 %v681_v25 }
 0x1da   :  { %v661_v33 = vpop.xlane.xlu0 %660 }
 0x1db   :  { %v672_v34 = vmul.f32 %v671_v32, %v661_v33 }
 0x1dc   :  { %v680_v35 = vpop.xlane.xlu1 %679 }
 0x1dd   :  { %v684_v36 = vmul.f32 %v680_v35, %v671_v32  ;;  %v686_v37 = vmul.f32 %v672_v34, %v672_v34  ;;  %v692_v59 = vsub.f32 %v1356_v6, %v672_v34  ;;  %v693_v60 = vsub.f32 %v1358_v9, %v672_v34 }
 0x1df   :  { %v688_v38 = vsub.f32 %v684_v36, %v686_v37 }
 0x1e1   :  { %v690_v39 = vmax.f32 %v688_v38, 0.0 }
 0x1e2   :  { %v664_v40 = vpop.xlane.xlu0 %663 }
 0x1e3   :  { %v696_v41 = vadd.f32 1e-05, %v690_v39  ;;  %v673_v42 = vmul.f32 %v671_v32, %v664_v40 }
 0x1e4   :  { %v683_v43 = vpop.xlane.xlu1 %682 }
 0x1e5   :  { %1120 = vrsqrt.f32 %v696_v41  ;;  %v685_v44 = vmul.f32 %v683_v43, %v671_v32  ;;  %v687_v45 = vmul.f32 %v673_v42, %v673_v42  ;;  %vm704_vm2 = vweird.f32 %v696_v41 }
 0x1e6   :  { %v694_v16 = vsub.f32 %v1366_v18, %v673_v42  ;;  %v695_v17 = vsub.f32 %v1368_v21, %v673_v42 }
 0x1e7   :  { %v689_v46 = vsub.f32 %v685_v44, %v687_v45 }
 0x1e9   :  { %v691_v47 = vmax.f32 %v689_v46, 0.0 }
 0x1eb   :  { %v1121_v48 = vpop.eup %1120  ;;  %v697_v50 = vadd.f32 1e-05, %v691_v47 }
 0x1ec   :  { %v699_v49 = vmul.f32 %v1121_v48, %v696_v41  ;;  %vm705_vm1 = vweird.f32 %v1121_v48 }
 0x1ed   :  { %1122 = vrsqrt.f32 %v697_v50  ;;  %vm706_vm3 = vmor %vm704_vm2, %vm705_vm1  ;;  %vm714_vm5 = vweird.f32 %v697_v50 }
 0x1ee   :  { %v700_v51 = vmul.f32 %v1121_v48, %v699_v49 }
 0x1f0   :  { %v701_v52 = vmul.f32 0.5, %v700_v51 }
 0x1f2   :  { %v702_v54 = vsub.f32 1.5, %v701_v52 }
 0x1f3   :  { %v1123_v56 = vpop.eup %1122 }
 0x1f4   :  { %v703_v57 = vmul.f32 %v1121_v48, %v702_v54  ;;  %v709_v61 = vmul.f32 %v1123_v56, %v697_v50  ;;  %vm715_vm4 = vweird.f32 %v1123_v56 }
 0x1f5   :  { %vm716_vm6 = vmor %vm714_vm5, %vm715_vm4 }
 0x1f6   :  { %v707_v63 = vsel %vm706_vm3, %v1121_v48, %v703_v57  ;;  %v710_v3 = vmul.f32 %v1123_v56, %v709_v61 }
 0x1f7   :  { %v718_v1 = vmul.f32 %v707_v63, %v692_v59  ;;  %v719_v2 = vmul.f32 %v707_v63, %v693_v60 }
 0x1f8   :  { %v711_v5 = vmul.f32 0.5, %v710_v3 }
 0x1f9   :  { %v728_v7 = vmul.f32 %v724_v58, %v718_v1  ;;  %v729_v8 = vmul.f32 %v725_v62, %v719_v2 }
 0x1fa   :  { %v712_v10 = vsub.f32 1.5, %v711_v5 }
 0x1fb   :  { %v738_v11 = vadd.f32 %v734_v0, %v728_v7  ;;  %v739_v12 = vadd.f32 %v735_v4, %v729_v8 }
 0x1fc   :  { %v713_v13 = vmul.f32 %v1123_v56, %v712_v10 }
 0x1fd   :  { %v742_v14 = vadd.f32 %v738_v11, %v1356_v6  ;;  %v743_v15 = vadd.f32 %v739_v12, %v1358_v9 }
 0x1fe   :  { %v717_v19 = vsel %vm716_vm6, %v1123_v56, %v713_v13 }
 0x1ff   :  { %v746_v20 = vpack.c.bf16 %v743_v15, %v742_v14  ;;  %v720_v22 = vmul.f32 %v717_v19, %v694_v16  ;;  %v721_v23 = vmul.f32 %v717_v19, %v695_v17 }
 0x201   :  { %748 = vst [vmem:[#allocation11] sm:$0xff] %v746_v20  ;;  %v730_v24 = vmul.f32 %v724_v58, %v720_v22  ;;  %v731_v25 = vmul.f32 %v725_v62, %v721_v23 }
 0x203   :  { %v740_v26 = vadd.f32 %v734_v0, %v730_v24  ;;  %v741_v27 = vadd.f32 %v735_v4, %v731_v25 }
 0x205   :  { %v744_v6 = vadd.f32 %v740_v26, %v1366_v18  ;;  %v745_v9 = vadd.f32 %v741_v27, %v1368_v21 }
 0x207   :  { %v747_v28 = vpack.c.bf16 %v745_v9, %v744_v6 }
 0x209   :  { %749 = vst [vmem:[#allocation11 + $0x8] sm:$0xff] %v747_v28 }
 0x20a   :  { %762 = dma.vmem_to_hbm [thread:$0]  %s755_s26, 256, %s757_s29, [#allocation4], %s1277_s9, %s1277_s9, %s1278_s10  }
 0x20b   :  { %1274 = dma.done.wait [#allocation4], 256  }
 0x20c   :  { %1275 = vsyncadd [#allocation4], 4294967040 }
 0x20d   :  { %767 = vsyncpa [#allocation3], 1 }
 0x20e   :  { %768 = vsyncpa [#allocation6], 1 }
 0x20f   :  { %769 = vsyncpa [#allocation9], 1 }
 0x210   :  { %770 = vsyncpa [#allocation4], 1 }

</bundles_post_ra>
